<compile_context>
chip_gen: v6e
topology: v6e:2x2x1
jax: 0.10.0
libtpu: 0.0.40
codegen_flags: <defaults>
</compile_context>

<pallas_src>
import functools

import jax
import jax.numpy as jnp
from jax.experimental import pallas as pl
from jax.experimental.pallas import tpu as pltpu


def simcse_head_kernel(cls_ref, w1t_ref, p_ref, w2t_ref, b2_ref,
                       feat_ref, stats_ref, *, inv_batch):
    """Two-phase projection head.

    grid = (2, num_batch_tiles)
      phase 0: accumulate per-feature sum / sum-of-squares of h = cls @ W1^T
               across batch tiles (single-pass BN statistics); on the last
               tile, finalize the fused per-feature scale/shift in-place.
      phase 1: recompute h per tile, apply fused BN + ReLU + Linear2, write
               the feature tile.

    cls_ref:  [bt, H]   bf16   CLS hidden-state tile (cast in the wrapper)
    w1t_ref:  [H, H]    bf16   W1^T
    p_ref:    [2, H]    f32    rows = (gamma, beta)   (b1 dropped: cancels)
    w2t_ref:  [H, OUT]  bf16   W2^T
    b2_ref:   [1, OUT]  f32
    feat_ref: [bt, OUT] f32
    stats_ref:[2, H]    f32    scratch: (sum, sumsq) -> (scale, shift)
    """
    phase = pl.program_id(0)
    j = pl.program_id(1)
    nbt = pl.num_programs(1)

    # Linear 1 on the bf16 MXU path, f32 accumulation.  NOTE: b1 is dropped on
    # purpose -- a constant per-feature bias added before training-mode
    # BatchNorm cancels exactly (the batch mean shifts by the same amount).
    h = jnp.dot(cls_ref[...], w1t_ref[...], preferred_element_type=jnp.float32)

    @pl.when(phase == 0)
    def _():
        @pl.when(j == 0)
        def _():
            stats_ref[...] = jnp.zeros_like(stats_ref)

        # Single-pass statistics: the two reductions are independent (no
        # mean -> diff -> var chain) and accumulate across batch tiles.
        stats_ref[0:1, :] += jnp.sum(h, axis=0, keepdims=True)
        stats_ref[1:2, :] += jnp.sum(h * h, axis=0, keepdims=True)

        @pl.when(j == nbt - 1)
        def _():
            mean = stats_ref[0:1, :] * inv_batch
            var = stats_ref[1:2, :] * inv_batch - mean * mean
            # gamma folded into the rsqrt: one [1,H] multiply instead of a
            # second [B,H] broadcast multiply; rsqrt runs on the EUP.
            scale = p_ref[0:1, :] * jax.lax.rsqrt(var + 1e-5)
            shift = p_ref[1:2, :] - mean * scale
            stats_ref[0:1, :] = scale
            stats_ref[1:2, :] = shift

    @pl.when(phase == 1)
    def _():
        # Fused BN (scale/shift) + ReLU, all in f32 (v5e has no bf16 VPU/EUP).
        y = jnp.maximum(h * stats_ref[0:1, :] + stats_ref[1:2, :], 0.0)
        feat = jnp.dot(y.astype(jnp.bfloat16), w2t_ref[...],
                       preferred_element_type=jnp.float32) + b2_ref[...]
        feat_ref[...] = feat.astype(feat_ref.dtype)


def prepare_head_params(w1, b1, gamma, beta, w2, b2):
    """One-time weight preprocessing (hoisted out of the per-call path)."""
    del b1  # cancels under training-mode (batch-statistics) BatchNorm
    w1t = w1.T.astype(jnp.bfloat16)                                   # [H, H]
    w2t = w2.T.astype(jnp.bfloat16)                                   # [H, OUT]
    params = jnp.stack([gamma, beta], axis=0).astype(jnp.float32)     # [2, H]
    b2_ = b2.reshape(1, -1).astype(jnp.float32)                       # [1, OUT]
    return w1t, params, w2t, b2_


def simcse_forward(last_hidden_state, w1t, params, w2t, b2_, *, batch_tile=None):
    """Returns (bert_cls_hidden_state [B,H] f32, feature [B,OUT] f32)."""
    B, S, H = last_hidden_state.shape
    OUT = w2t.shape[1]

    # CLS token sliced in the wrapper: the kernel never touches [B,S,H].
    cls = last_hidden_state[:, 0, :]                     # f32, returned as-is
    cls_bf = cls.astype(jnp.bfloat16)                    # halved kernel DMA

    if batch_tile is None:
        batch_tile = B if B <= 256 else 256
    bt = batch_tile
    if bt != B:
        # bf16 packs 16 sublanes per vreg; tiles must also divide B evenly.
        # TODO(synk): pad + mask the BN reduction for non-divisible batches.
        assert B % bt == 0 and bt % 16 == 0, (B, bt)
    nbt = B // bt

    kernel = functools.partial(simcse_head_kernel, inv_batch=1.0 / B)

    cost = pl.CostEstimate(
        flops=2 * (2 * B * H * H) + 2 * B * H * OUT + 8 * B * H,
        transcendentals=H,                               # rsqrt over H features
        bytes_accessed=(2 * cls_bf.size * 2 + w1t.size * 2 + w2t.size * 2
                        + params.size * 4 + b2_.size * 4 + B * OUT * 4),
    )

    feat = pl.pallas_call(
        kernel,
        out_shape=jax.ShapeDtypeStruct((B, OUT), jnp.float32),
        grid_spec=pltpu.PrefetchScalarGridSpec(
            num_scalar_prefetch=0,
            grid=(2, nbt),                               # (phase, batch tile)
            in_specs=[
                pl.BlockSpec((bt, H), lambda p, j: (j, 0)),     # cls  (bf16)
                pl.BlockSpec((H, H), lambda p, j: (0, 0)),      # W1^T (bf16)
                pl.BlockSpec((2, H), lambda p, j: (0, 0)),      # gamma/beta
                pl.BlockSpec((H, OUT), lambda p, j: (0, 0)),    # W2^T (bf16)
                pl.BlockSpec((1, OUT), lambda p, j: (0, 0)),    # b2
            ],
            # Block 0 for the whole stats phase (no spurious write-backs of an
            # unwritten buffer), block j during phase 1 -> each output block
            # is written exactly once, lane-dense (OUT multiple of 128).
            out_specs=pl.BlockSpec((bt, OUT), lambda p, j: (p * j, 0)),
            scratch_shapes=[pltpu.VMEM((2, H), jnp.float32)],
        ),
        compiler_params=pltpu.CompilerParams(
            dimension_semantics=("arbitrary", "arbitrary"),
            vmem_limit_bytes=32 * 1024 * 1024,
        ),
        cost_estimate=cost,
    )(cls_bf, w1t, params, w2t, b2_)

    return cls, feat


def reference_forward(last_hidden_state, w1, b1, gamma, beta, w2, b2):
    """Pure-JAX reference of the PyTorch head with bf16-MXU / f32-acc matmuls."""
    cls = last_hidden_state[:, 0, :].astype(jnp.float32)
    h = jnp.dot(cls.astype(jnp.bfloat16), w1.T.astype(jnp.bfloat16),
                preferred_element_type=jnp.float32) + b1
    mean = jnp.mean(h, axis=0, keepdims=True)
    var = jnp.mean((h - mean) ** 2, axis=0, keepdims=True)
    y = gamma * (h - mean) / jnp.sqrt(var + 1e-5) + beta
    y = jnp.maximum(y, 0.0)
    feat = jnp.dot(y.astype(jnp.bfloat16), w2.T.astype(jnp.bfloat16),
                   preferred_element_type=jnp.float32) + b2
    return cls, feat


if __name__ == "__main__":
    # Small shapes consistent with the module's head (hidden -> hidden -> 256).
    # B=32 with batch_tile=16 exercises the multi-tile two-phase BN path.
    B, S, H, OUT = 32, 8, 128, 256

    key = jax.random.PRNGKey(0)
    # Synthetic stand-in for BERT's last_hidden_state (pretrained encoder not
    # reproducible without a checkpoint).
    last_hidden_state = jax.random.normal(key, (B, S, H), dtype=jnp.float32)

    # Parameters exactly as initialized in SimCSE.__init__:
    #   head[0]: Linear(H,H)    weight = eye(H,H),   bias = 0
    #   head[1]: BatchNorm1d(H) gamma = 1, beta = 0
    #   head[3]: Linear(H,256)  weight = eye(256,H), bias = 0
    w1 = jnp.eye(H, H, dtype=jnp.float32)
    b1 = jnp.zeros((H,), dtype=jnp.float32)
    gamma = jnp.ones((H,), dtype=jnp.float32)
    beta = jnp.zeros((H,), dtype=jnp.float32)
    w2 = jnp.eye(OUT, H, dtype=jnp.float32)
    b2 = jnp.zeros((OUT,), dtype=jnp.float32)

    # One-time preprocessing, outside the per-call path.
    w1t, params, w2t, b2_ = prepare_head_params(w1, b1, gamma, beta, w2, b2)

    fwd = jax.jit(simcse_forward, static_argnames=("batch_tile",))
    cls_out, feat_out = fwd(last_hidden_state, w1t, params, w2t, b2_,
                            batch_tile=16)
    jax.block_until_ready((cls_out, feat_out))

    cls_ref, feat_ref = reference_forward(last_hidden_state, w1, b1, gamma,
                                          beta, w2, b2)
    assert jnp.allclose(cls_out, cls_ref, atol=1e-5, rtol=1e-5)
    # Tolerance covers bf16 matmul quantization plus the (mathematically
    # identical) single-pass-variance / folded-scale algebra.
    assert jnp.allclose(feat_out, feat_ref, atol=5e-2, rtol=5e-2)

    print("KERNEL_OK")
</pallas_src>

<mosaic_0001>
module attributes {stable_mosaic.version = 11 : i64} {
  func.func @simcse_head_kernel(%arg0: i32, %arg1: i32, %arg2: memref<16x128xbf16, #tpu.memory_space<vmem>>, %arg3: memref<128x128xbf16, #tpu.memory_space<vmem>>, %arg4: memref<2x128xf32, #tpu.memory_space<vmem>>, %arg5: memref<128x256xbf16, #tpu.memory_space<vmem>>, %arg6: memref<1x256xf32, #tpu.memory_space<vmem>>, %arg7: memref<16x256xf32, #tpu.memory_space<vmem>>, %arg8: memref<2x128xf32, #tpu.memory_space<vmem>>) attributes {dimension_semantics = [#tpu.dimension_semantics<arbitrary>, #tpu.dimension_semantics<arbitrary>], iteration_bounds = array<i64: 2, 2>, scalar_prefetch = 0 : i64, scratch_operands = 1 : i64, tpu.core_type = #tpu.core_type<tc>, window_params = [{transform_indices = @transform_0, window_bounds = array<i64: 16, 128>}, {pipeline_mode = #tpu.pipeline_mode<synchronous>, transform_indices = @transform_1, window_bounds = array<i64: 128, 128>}, {pipeline_mode = #tpu.pipeline_mode<synchronous>, transform_indices = @transform_2, window_bounds = array<i64: 2, 128>}, {pipeline_mode = #tpu.pipeline_mode<synchronous>, transform_indices = @transform_3, window_bounds = array<i64: 128, 256>}, {pipeline_mode = #tpu.pipeline_mode<synchronous>, transform_indices = @transform_4, window_bounds = array<i64: 1, 256>}, {transform_indices = @transform_5, window_bounds = array<i64: 16, 256>}]} {
    %c0 = arith.constant 0 : index
    %c0_0 = arith.constant 0 : index
    %0 = vector.load %arg2[%c0, %c0_0] : memref<16x128xbf16, #tpu.memory_space<vmem>>, vector<16x128xbf16>
    %c0_1 = arith.constant 0 : index
    %c0_2 = arith.constant 0 : index
    %1 = vector.load %arg3[%c0_1, %c0_2] : memref<128x128xbf16, #tpu.memory_space<vmem>>, vector<128x128xbf16>
    %cst = arith.constant dense<0.000000e+00> : vector<16x128xf32>
    %2 = tpu.matmul %0, %1, %cst {dimension_numbers = #tpu.dot_dimension_numbers<[1], [0], [0], [1], [0, 0, 1, 1], [], []>} : vector<16x128xbf16>, vector<128x128xbf16>, vector<16x128xf32> -> vector<16x128xf32>
    %c0_i32 = arith.constant 0 : i32
    %3 = arith.cmpi eq, %arg0, %c0_i32 : i32
    %4 = arith.extui %3 : i1 to i32
    %c0_i32_3 = arith.constant 0 : i32
    %5 = arith.cmpi ne, %4, %c0_i32_3 : i32
    scf.if %5 {
      %c0_i32_5 = arith.constant 0 : i32
      %9 = arith.cmpi eq, %arg1, %c0_i32_5 : i32
      %10 = arith.extui %9 : i1 to i32
      %c0_i32_6 = arith.constant 0 : i32
      %11 = arith.cmpi ne, %10, %c0_i32_6 : i32
      scf.if %11 {
        %cst_18 = arith.constant 0.000000e+00 : f32
        %26 = vector.broadcast %cst_18 : f32 to vector<2x128xf32>
        %c0_19 = arith.constant 0 : index
        %c0_20 = arith.constant 0 : index
        %27 = vector.load %arg8[%c0_19, %c0_20] : memref<2x128xf32, #tpu.memory_space<vmem>>, vector<2x128xf32>
        tpu.vector_store %arg8[%c0_19, %c0_20], %26 {strides = array<i32>} : memref<2x128xf32, #tpu.memory_space<vmem>>, vector<2x128xf32>,
      } else {
      }
      %c0_7 = arith.constant 0 : index
      %c0_8 = arith.constant 0 : index
      %12 = vector.load %arg8[%c0_7, %c0_8] : memref<2x128xf32, #tpu.memory_space<vmem>>, vector<1x128xf32>
      %cst_9 = arith.constant dense<0.000000e+00> : vector<128xf32>
      %13 = vector.multi_reduction <add>, %2, %cst_9 [0] : vector<16x128xf32> to vector<128xf32>
      %14 = vector.shape_cast %13 : vector<128xf32> to vector<1x128xf32>
      %15 = arith.addf %12, %14 : vector<1x128xf32>
      %c0_10 = arith.constant 0 : index
      %c0_11 = arith.constant 0 : index
      %16 = vector.load %arg8[%c0_10, %c0_11] : memref<2x128xf32, #tpu.memory_space<vmem>>, vector<1x128xf32>
      tpu.vector_store %arg8[%c0_10, %c0_11], %15 {strides = array<i32>} : memref<2x128xf32, #tpu.memory_space<vmem>>, vector<1x128xf32>,
      %c1 = arith.constant 1 : index
      %c0_12 = arith.constant 0 : index
      %17 = vector.load %arg8[%c1, %c0_12] : memref<2x128xf32, #tpu.memory_space<vmem>>, vector<1x128xf32>
      %18 = arith.mulf %2, %2 : vector<16x128xf32>
      %cst_13 = arith.constant dense<0.000000e+00> : vector<128xf32>
      %19 = vector.multi_reduction <add>, %18, %cst_13 [0] : vector<16x128xf32> to vector<128xf32>
      %20 = vector.shape_cast %19 : vector<128xf32> to vector<1x128xf32>
      %21 = arith.addf %17, %20 : vector<1x128xf32>
      %c1_14 = arith.constant 1 : index
      %c0_15 = arith.constant 0 : index
      %22 = vector.load %arg8[%c1_14, %c0_15] : memref<2x128xf32, #tpu.memory_space<vmem>>, vector<1x128xf32>
      tpu.vector_store %arg8[%c1_14, %c0_15], %21 {strides = array<i32>} : memref<2x128xf32, #tpu.memory_space<vmem>>, vector<1x128xf32>,
      %c1_i32_16 = arith.constant 1 : i32
      %23 = arith.cmpi eq, %arg1, %c1_i32_16 : i32
      %24 = arith.extui %23 : i1 to i32
      %c0_i32_17 = arith.constant 0 : i32
      %25 = arith.cmpi ne, %24, %c0_i32_17 : i32
      scf.if %25 {
        %c0_18 = arith.constant 0 : index
        %c0_19 = arith.constant 0 : index
        %26 = vector.load %arg8[%c0_18, %c0_19] : memref<2x128xf32, #tpu.memory_space<vmem>>, vector<1x128xf32>
        %cst_20 = arith.constant 3.125000e-02 : f32
        %27 = vector.broadcast %cst_20 : f32 to vector<1x128xf32>
        %28 = arith.mulf %26, %27 : vector<1x128xf32>
        %c1_21 = arith.constant 1 : index
        %c0_22 = arith.constant 0 : index
        %29 = vector.load %arg8[%c1_21, %c0_22] : memref<2x128xf32, #tpu.memory_space<vmem>>, vector<1x128xf32>
        %cst_23 = arith.constant 3.125000e-02 : f32
        %30 = vector.broadcast %cst_23 : f32 to vector<1x128xf32>
        %31 = arith.mulf %29, %30 : vector<1x128xf32>
        %32 = arith.mulf %28, %28 : vector<1x128xf32>
        %33 = arith.subf %31, %32 : vector<1x128xf32>
        %c0_24 = arith.constant 0 : index
        %c0_25 = arith.constant 0 : index
        %34 = vector.load %arg4[%c0_24, %c0_25] : memref<2x128xf32, #tpu.memory_space<vmem>>, vector<1x128xf32>
        %cst_26 = arith.constant 9.99999974E-6 : f32
        %35 = vector.broadcast %cst_26 : f32 to vector<1x128xf32>
        %36 = arith.addf %33, %35 : vector<1x128xf32>
        %37 = math.rsqrt %36 : vector<1x128xf32>
        %38 = arith.mulf %34, %37 : vector<1x128xf32>
        %c1_27 = arith.constant 1 : index
        %c0_28 = arith.constant 0 : index
        %39 = vector.load %arg4[%c1_27, %c0_28] : memref<2x128xf32, #tpu.memory_space<vmem>>, vector<1x128xf32>
        %40 = arith.mulf %28, %38 : vector<1x128xf32>
        %41 = arith.subf %39, %40 : vector<1x128xf32>
        %c0_29 = arith.constant 0 : index
        %c0_30 = arith.constant 0 : index
        %42 = vector.load %arg8[%c0_29, %c0_30] : memref<2x128xf32, #tpu.memory_space<vmem>>, vector<1x128xf32>
        tpu.vector_store %arg8[%c0_29, %c0_30], %38 {strides = array<i32>} : memref<2x128xf32, #tpu.memory_space<vmem>>, vector<1x128xf32>,
        %c1_31 = arith.constant 1 : index
        %c0_32 = arith.constant 0 : index
        %43 = vector.load %arg8[%c1_31, %c0_32] : memref<2x128xf32, #tpu.memory_space<vmem>>, vector<1x128xf32>
        tpu.vector_store %arg8[%c1_31, %c0_32], %41 {strides = array<i32>} : memref<2x128xf32, #tpu.memory_space<vmem>>, vector<1x128xf32>,
      } else {
      }
    } else {
    }
    %c1_i32 = arith.constant 1 : i32
    %6 = arith.cmpi eq, %arg0, %c1_i32 : i32
    %7 = arith.extui %6 : i1 to i32
    %c0_i32_4 = arith.constant 0 : i32
    %8 = arith.cmpi ne, %7, %c0_i32_4 : i32
    scf.if %8 {
      %c0_5 = arith.constant 0 : index
      %c0_6 = arith.constant 0 : index
      %9 = vector.load %arg8[%c0_5, %c0_6] : memref<2x128xf32, #tpu.memory_space<vmem>>, vector<1x128xf32>
      %10 = vector.broadcast %9 : vector<1x128xf32> to vector<16x128xf32>
      %11 = arith.mulf %2, %10 : vector<16x128xf32>
      %c1 = arith.constant 1 : index
      %c0_7 = arith.constant 0 : index
      %12 = vector.load %arg8[%c1, %c0_7] : memref<2x128xf32, #tpu.memory_space<vmem>>, vector<1x128xf32>
      %13 = vector.broadcast %12 : vector<1x128xf32> to vector<16x128xf32>
      %14 = arith.addf %11, %13 : vector<16x128xf32>
      %cst_8 = arith.constant 0.000000e+00 : f32
      %15 = vector.broadcast %cst_8 : f32 to vector<16x128xf32>
      %16 = arith.maximumf %14, %15 : vector<16x128xf32>
      %17 = arith.truncf %16 : vector<16x128xf32> to vector<16x128xbf16>
      %c0_9 = arith.constant 0 : index
      %c0_10 = arith.constant 0 : index
      %18 = vector.load %arg5[%c0_9, %c0_10] : memref<128x256xbf16, #tpu.memory_space<vmem>>, vector<128x256xbf16>
      %cst_11 = arith.constant dense<0.000000e+00> : vector<16x256xf32>
      %19 = tpu.matmul %17, %18, %cst_11 {dimension_numbers = #tpu.dot_dimension_numbers<[1], [0], [0], [1], [0, 0, 1, 1], [], []>} : vector<16x128xbf16>, vector<128x256xbf16>, vector<16x256xf32> -> vector<16x256xf32>
      %c0_12 = arith.constant 0 : index
      %c0_13 = arith.constant 0 : index
      %20 = vector.load %arg6[%c0_12, %c0_13] : memref<1x256xf32, #tpu.memory_space<vmem>>, vector<1x256xf32>
      %21 = vector.broadcast %20 : vector<1x256xf32> to vector<16x256xf32>
      %22 = arith.addf %19, %21 : vector<16x256xf32>
      %c0_14 = arith.constant 0 : index
      %c0_15 = arith.constant 0 : index
      %23 = vector.load %arg7[%c0_14, %c0_15] : memref<16x256xf32, #tpu.memory_space<vmem>>, vector<16x256xf32>
      tpu.vector_store %arg7[%c0_14, %c0_15], %22 {strides = array<i32>} : memref<16x256xf32, #tpu.memory_space<vmem>>, vector<16x256xf32>,
    } else {
    }
    return
  }
  func.func @transform_0(%arg0: i32, %arg1: i32) -> (i32, i32) {
    %c0_i32 = arith.constant 0 : i32
    %c0_i32_0 = arith.constant 0 : i32
    return %arg1, %c0_i32 : i32, i32
  }
  func.func @transform_1(%arg0: i32, %arg1: i32) -> (i32, i32) {
    %c0_i32 = arith.constant 0 : i32
    %c0_i32_0 = arith.constant 0 : i32
    %c0_i32_1 = arith.constant 0 : i32
    return %c0_i32, %c0_i32_0 : i32, i32
  }
  func.func @transform_2(%arg0: i32, %arg1: i32) -> (i32, i32) {
    %c0_i32 = arith.constant 0 : i32
    %c0_i32_0 = arith.constant 0 : i32
    %c0_i32_1 = arith.constant 0 : i32
    return %c0_i32, %c0_i32_0 : i32, i32
  }
  func.func @transform_3(%arg0: i32, %arg1: i32) -> (i32, i32) {
    %c0_i32 = arith.constant 0 : i32
    %c0_i32_0 = arith.constant 0 : i32
    %c0_i32_1 = arith.constant 0 : i32
    return %c0_i32, %c0_i32_0 : i32, i32
  }
  func.func @transform_4(%arg0: i32, %arg1: i32) -> (i32, i32) {
    %c0_i32 = arith.constant 0 : i32
    %c0_i32_0 = arith.constant 0 : i32
    %c0_i32_1 = arith.constant 0 : i32
    return %c0_i32, %c0_i32_0 : i32, i32
  }
  func.func @transform_5(%arg0: i32, %arg1: i32) -> (i32, i32) {
    %0 = arith.muli %arg0, %arg1 : i32
    %c0_i32 = arith.constant 0 : i32
    %c0_i32_0 = arith.constant 0 : i32
    return %0, %c0_i32 : i32, i32
  }
}

</mosaic_0001>

<bundles_post_ra>
// kernel: simcse_forward.1
= control target key start
LH: loop header
LB: loop body
LE: loop exit
PB: predicated region body
PF: predicated region fallthrough
CT: control target
= control target key end

     0   :  { %10 = vsyncpa [#allocation4], 0  ;;  %s1284_s0 = inlined_call_operand.vmem [shape: bf16[32,128], index: 0, kind: input, shape index: {}]   ;;  %s1285_s1 = inlined_call_operand.vmem [shape: bf16[128,128], index: 1, kind: input, shape index: {}]   ;;  %s1286_s2 = inlined_call_operand.vmem [shape: f32[2,128], index: 2, kind: input, shape index: {}]   ;;  %s1287_s3 = inlined_call_operand.hbm [shape: bf16[128,256], index: 3, kind: input, shape index: {}]   ;;  %s1288_s4 = inlined_call_operand.vmem [shape: f32[1,256], index: 4, kind: input, shape index: {}]   ;;  %s1289_s5 = inlined_call_operand.hbm [shape: f32[32,256], index: 5, kind: output, shape index: {}]  }
   0x1   :  { %11 = vsyncpa [#allocation5], 0 }
   0x2   :  { %13 = vsyncpa [#allocation5 + $0x1], 0  ;;  %s1064_s18 = smov 0   ;;  %s1066_s19 = smov 0  }
   0x3   :  { %s1068_s20 = smov 0   ;;  %s1070_s21 = smov 0  }
   0x4   :  { %s1072_s22 = smov 0   ;;  %s1074_s23 = smov 0  }
   0x5   :  { %s1076_s24 = smov 0   ;;  %s1078_s25 = smov 0  }
   0x6 LB: > { %s697_s26 = sadd.s32 4294967295, %s1022_s25   ;;  %s698_s27 = sadd.s32 4294967294, %s1022_s25   ;;  %s1022_s25 = sphi %s1078_s25, %s19_s25   ;;  %s1018_s24 = sphi %s1076_s24, %s1303_s24   ;;  %s1014_s23 = sphi %s1074_s23, %s1302_s23   ;;  %s1010_s22 = sphi %s1072_s22, %s1301_s22   ;;  %s1006_s21 = sphi %s1070_s21, %s1300_s21   ;;  %s1002_s20 = sphi %s1068_s20, %s1299_s20   ;;  %s998_s19 = sphi %s1066_s19, %s1298_s19   ;;  %s994_s18 = sphi %s1064_s18, %s1297_s18  }
   0x7   : > { %s28_s28 = sadd.s32 1, %s1014_s23  ;;  %s31_s29 = sadd.s32 1, %s1018_s24 }
   0x8   : > { %p29_p0 = scmp.ge.s32.totalorder %s28_s28, 2  ;;  %s145_s30 = smul.u32 %s1014_s23, %s1018_s24 }
   0x9   : > { %s150_s6 = sadd.s32 1, %s1002_s20  ;;  %p160_p1 = scmp.ne.s32.totalorder %s1002_s20, %s998_s19 }
   0xa   : > { %s1305_s28 = smov (%p29_p0, %s28_s28), 0  ;;  %s1307_s29 = smov (!%p29_p0, %s31_s29), %s1018_s24 }
   0xb   : > { %p161_p2 = scmp.eq.s32.totalorder %s697_s26, 3  ;;  %p166_p3 = scmp.ne.s32.totalorder %s998_s19, %s994_s18 }
   0xc   : > { %p33_p4 = scmp.ge.s32.totalorder %s1307_s29, 2  ;;  %p167_p5 = scmp.eq.s32.totalorder %s698_s27, 3 }
   0xd   : > { %p1118_p6 = por %p161_p2, %p160_p1  ;;  %p699_p7 = scmp.ge.s32.totalorder %s1022_s25, 1 }
   0xe   : > { %s1309_s29 = smov (%p33_p4, %s1307_s29), 0  ;;  %p1125_p8 = por %p167_p5, %p166_p3 }
   0xf   : > { %p174_p9 = scmp.lt.s32.totalorder %s1022_s25, 5  ;;  %s146_s9 = smul.u32 %s1309_s29, %s1305_s28 }
  0x10   : > { %s1292_s8 = scalar_select %p1125_p8, 1, 0 }
  0x11   : > { %p1132_p10 = pnand %p699_p7, %p174_p9  ;;  %p1136_p11 = scmp.eq.s32.totalorder %s697_s26, 0 }
  0x12   : > { %s147_s12 = ssub.s32 %s145_s30, %s146_s9  ;;  %s1024_s13 = smov [#allocation3]  }
  0x13   : > { %p148_p12 = scmp.eq.s32.totalorder %s147_s12, 0  ;;  %p781_p13 = pneg %p1132_p10 }
  0x14   : > { %s192_s14 = sshll.u32 %s1024_s13, 4  ;;  %s193_s14 = int_to_ptr.vmem [resolvable:$true] %s192_s14 }
  0x15   : > { %s1143_s15 = scalar_select %p148_p12, %s1002_s20, %s150_s6  }
  0x16   : > { %p782_p0 = pnand %p1136_p11, %p781_p13  ;;  %s911_s16 = scalar_lea.vmem %s193_s14, 2048 }
  0x17   : > { %p912_p2 = scmp.ne.s32.totalorder %s193_s14, %s911_s16  ;;  %p919_p5 = scmp.lt.s32.totalorder %s193_s14, %s193_s14 }
  0x18   : > { %p902_p1 = pneg %p782_p0  ;;  %p920_p7 = scmp.lt.s32.totalorder %s911_s16, %s911_s16 }
  0x1a   : > { %p914_p3 = pnand %p912_p2, %p902_p1  ;;  %p921_p9 = por %p920_p7, %p919_p5 }
  0x1c   : > { %p915_p4 = pneg %p914_p3 }
  0x1e   : > { %p922_p8 = pnand %p921_p9, %p915_p4 }
  0x20   : > { %925 = shalt.err (!%p922_p8)
}
  0x21   : > { %s1025_s17 = smov 128   ;;  %s1026_s26 = smov 8  }
  0x22   : > { %784 = dma.hbm_to_vmem [thread:$0]  (!%p782_p0), %s1287_s3, 2048, %s193_s14, [#allocation4], %s1025_s17, %s1025_s17, %s1026_s26  }
  0x23   : > { %220 = sbr.rel (%p1132_p10) target bundleno = 601 (0x259), region = 40 }
  0x28   : > { %985 = dma.done.wait (%p1136_p11), [#allocation4], 2048  }
  0x29   : > { %987 = vsyncadd (%p1136_p11), [#allocation4], 4294965248  ;;  %s1290_s6 = sand.u32 1, %s998_s19   ;;  %s705_s9 = sshll.u32 %s1006_s21, 1  ;;  %v1027_v0 = vmov 0.0   ;;  %vm1028_vm0 = vmmov 0  }
  0x2a   : > { %s1160_s12 = sshll.u32 %s1290_s6, 5  ;;  %755 = vmatprep.subr.bf16.mxu0 %v1027_v0  ;;  %771 = vmatprep.mubr.msk.bf16.mxu0 %vm1028_vm0, %v1027_v0  ;;  %p249_p8 = scmp.lt.s32.totalorder %s705_s9, 3  ;;  %v865_v1 = vld [vmem:[%s1285_s1 + $0x38] sm:$0xff]   ;;  %v866_v2 = vld [vmem:[%s1285_s1 + $0x30] sm:$0xff]   ;;  %v867_v3 = vld [vmem:[%s1285_s1 + $0x28] sm:$0xff]  }
  0x2b   : > { %756 = vmatpush3.bf16.msra.mxu0 %v865_v1  ;;  %v868_v4 = vld [vmem:[%s1285_s1 + $0x20] sm:$0xff]   ;;  %v869_v5 = vld [vmem:[%s1285_s1 + $0x18] sm:$0xff]   ;;  %v870_v6 = vld [vmem:[%s1285_s1 + $0x10] sm:$0xff]   ;;  %s1194_s10 = scalar_lea.vmem [#allocation6], %s1160_s12  ;;  %p716_p10 = scmp.ne.s32.totalorder %s1010_s22, 0 }
  0x2c   : > { %s1311_s9 = smov (!%p249_p8, %s705_s9), 3  ;;  %757 = vmatprep.subr.bf16.mxu0 %v1027_v0  ;;  %v871_v7 = vld [vmem:[%s1285_s1 + $0x8] sm:$0xff]   ;;  %v872_v8 = vld [vmem:[%s1285_s1] sm:$0xff]   ;;  %p717_p11 = scmp.ne.s32.totalorder (!%p716_p10), %s1006_s21, 0 }
  0x2d   : > { %s706_s16 = sshll.u32 %s1311_s9, 2 }
  0x2e   : > { %s252_s6 = scalar_lea.vmem %s1284_s0, %s706_s16 }
  0x2f   : > { %758 = vmatpush3.bf16.msra.mxu0 %v866_v2  ;;  %v873_v9 = vld [vmem:[%s252_s6] sm:$0xff]  }
  0x30   : > { %759 = vmatprep.subr.bf16.mxu0 %v1027_v0 }
  0x33   : > { %760 = vmatpush3.bf16.msra.mxu0 %v867_v3 }
  0x34   : > { %761 = vmatprep.subr.bf16.mxu0 %v1027_v0 }
  0x37   : > { %762 = vmatpush3.bf16.msra.mxu0 %v868_v4 }
  0x38   : > { %763 = vmatprep.subr.bf16.mxu0 %v1027_v0 }
  0x3b   : > { %764 = vmatpush3.bf16.msra.mxu0 %v869_v5 }
  0x3c   : > { %765 = vmatprep.subr.bf16.mxu0 %v1027_v0 }
  0x3f   : > { %766 = vmatpush3.bf16.msra.mxu0 %v870_v6 }
  0x40   : > { %767 = vmatprep.subr.bf16.mxu0 %v1027_v0 }
  0x43   : > { %768 = vmatpush3.bf16.msra.mxu0 %v871_v7 }
  0x44   : > { %769 = vmatprep.subr.bf16.mxu0 %v1027_v0 }
  0x47   : > { %770 = vmatpush3.bf16.msra.mxu0 %v872_v8 }
  0x4a   : > { %772 = vmatmul.mubr.bf16.vlgmr.msra.gmra.mxu0 %v873_v9 }
 0x10a   : > { %v1189_v10 = vpop.f32.mrf.mxu0 }
 0x10c   : > { %v773_v11 = vpop.f32.mrf.mxu0  ;;  %373 = sbr.rel (%p716_p10) target bundleno = 333 (0x14d), region = 48 }
 0x10e   : > { %v1191_v12 = vpop.f32.mrf.mxu0 }
 0x110   : > { %v774_v13 = vpop.f32.mrf.mxu0 }
 0x111   : > { %377 = sbr.rel (%p717_p11) target bundleno = 280 (0x118), region = 52 }
 0x116   : > { %v1029_v14 = vmov 0.0  }
 0x117   : > { %378 = vst [vmem:[#allocation2] sm:$0x3] %v1029_v14 }
 0x118 PF: > { %v380_v15 = vadd.f32 %v1191_v12, %v1189_v10  ;;  %v390_v16 = vmul.f32 %v1189_v10, %v1189_v10  ;;  %v391_v17 = vmul.f32 %v1191_v12, %v1191_v12  ;;  %p718_p12 = scmp.ne.s32.totalorder %s1006_s21, 1 }
 0x11a   : > { %v381_v18 = vrot.slane %v380_v15, 4  ;;  %v392_v19 = vadd.f32 %v391_v17, %v390_v16 }
 0x11c   : > { %v382_v20 = vadd.f32 %v381_v18, %v380_v15  ;;  %v393_v21 = vrot.slane %v392_v19, 4 }
 0x11e   : > { %v383_v22 = vrot.slane %v382_v20, 2  ;;  %v394_v23 = vadd.f32 %v393_v21, %v392_v19  ;;  %v379_v28 = vld [vmem:[#allocation2] sm:$0x1]  ;;  %v389_v31 = vld [vmem:[#allocation2 + $0x1] sm:$0x1] }
 0x120   : > { %v384_v24 = vadd.f32 %v383_v22, %v382_v20  ;;  %v395_v25 = vrot.slane %v394_v23, 2 }
 0x122   : > { %v385_v26 = vrot.slane %v384_v24, 1  ;;  %v396_v27 = vadd.f32 %v395_v25, %v394_v23 }
 0x124   : > { %v386_v29 = vadd.f32 %v385_v26, %v384_v24  ;;  %v397_v30 = vrot.slane %v396_v27, 1 }
 0x126   : > { %v387_v32 = vadd.f32 %v386_v29, %v379_v28  ;;  %v398_v33 = vadd.f32 %v397_v30, %v396_v27  ;;  %404 = sbr.rel (%p718_p12) target bundleno = 333 (0x14d), region = 56 }
 0x128   : > { %388 = vst [vmem:[#allocation2] sm:$0x1] %v387_v32  ;;  %v399_v34 = vadd.f32 %v398_v33, %v389_v31 }
 0x12a   : > { %400 = vst [vmem:[#allocation2 + $0x1] sm:$0x1] %v399_v34 }
 0x12b   : > { %v411_v42 = vld [vmem:[%s1286_s2] sm:$0x1]  ;;  %v415_v45 = vld [vmem:[%s1286_s2 + $0x1] sm:$0x1] }
 0x12f   : > { %v405_v35 = vld [vmem:[#allocation2] sm:$0x1] }
 0x130   : > { %v406_v37 = vmul.f32 0.03125, %v405_v35 }
 0x131   : > { %v407_v36 = vld [vmem:[#allocation2 + $0x1] sm:$0x1] }
 0x132   : > { %v408_v38 = vmul.f32 0.03125, %v407_v36  ;;  %v409_v39 = vmul.f32 %v406_v37, %v406_v37 }
 0x134   : > { %v410_v40 = vsub.f32 %v408_v38, %v409_v39 }
 0x136   : > { %v412_v41 = vadd.f32 1e-05, %v410_v40 }
 0x138   : > { %874 = vrsqrt.f32 %v412_v41 }
 0x145   : > { %v875_v43 = vpop.eup %874 }
 0x146   : > { %v414_v44 = vmul.f32 %v875_v43, %v411_v42 }
 0x148   : > { %418 = vst [vmem:[#allocation2] sm:$0x1] %v414_v44  ;;  %v416_v46 = vmul.f32 %v414_v44, %v406_v37 }
 0x14a   : > { %v417_v47 = vsub.f32 %v415_v45, %v416_v46 }
 0x14c   : > { %419 = vst [vmem:[#allocation2 + $0x1] sm:$0x1] %v417_v47 }
 0x14d PF: > { %p719_p13 = scmp.ne.s32.totalorder %s1010_s22, 1 }
 0x14f   : > { %423 = sbr.rel (%p719_p13) target bundleno = 575 (0x23f), region = 60 }
 0x154   : > { %v876_v48 = vld [vmem:[#allocation3 + $0x74] ss:$8 sps:$4 sm:$0xff]   ;;  %v878_v49 = vld [vmem:[#allocation3 + $0x70] ss:$8 sps:$4 sm:$0xff]   ;;  %v1030_v50 = vmov 0  }
 0x155   : > { %581 = vmatprep.mubr.bf16.mxu0 %v1030_v50  ;;  %549 = vmatprep.subr.bf16.mxu0 %v876_v48  ;;  %v879_v51 = vld [vmem:[#allocation3 + $0x64] ss:$8 sps:$4 sm:$0xff]   ;;  %v881_v52 = vld [vmem:[#allocation3 + $0x60] ss:$8 sps:$4 sm:$0xff]   ;;  %v882_v53 = vld [vmem:[#allocation3 + $0x54] ss:$8 sps:$4 sm:$0xff]  }
 0x156   : > { %550 = vmatpush1.bf16.msra.mxu0 %v878_v49  ;;  %v884_v54 = vld [vmem:[#allocation3 + $0x50] ss:$8 sps:$4 sm:$0xff]   ;;  %v885_v55 = vld [vmem:[#allocation3 + $0x44] ss:$8 sps:$4 sm:$0xff]   ;;  %v887_v56 = vld [vmem:[#allocation3 + $0x40] ss:$8 sps:$4 sm:$0xff]  }
 0x157   : > { %551 = vmatprep.subr.bf16.mxu0 %v879_v51  ;;  %v888_v57 = vld [vmem:[#allocation3 + $0x34] ss:$8 sps:$4 sm:$0xff]   ;;  %v890_v58 = vld [vmem:[#allocation3 + $0x30] ss:$8 sps:$4 sm:$0xff]   ;;  %v891_v60 = vld [vmem:[#allocation3 + $0x24] ss:$8 sps:$4 sm:$0xff]  }
 0x158   : > { %v720_v59 = vld [vmem:[#allocation2] ss:$0 sm:$0xff]  ;;  %v893_v63 = vld [vmem:[#allocation3 + $0x20] ss:$8 sps:$4 sm:$0xff]   ;;  %v721_v0 = vld [vmem:[#allocation2 + $0x1] ss:$0 sm:$0xff] }
 0x159   : > { %v429_v61 = vmul.f32 %v720_v59, %v1189_v10  ;;  %v430_v62 = vmul.f32 %v720_v59, %v1191_v12  ;;  %v894_v1 = vld [vmem:[#allocation3 + $0x14] ss:$8 sps:$4 sm:$0xff]   ;;  %v896_v4 = vld [vmem:[#allocation3 + $0x10] ss:$8 sps:$4 sm:$0xff]   ;;  %v897_v5 = vld [vmem:[#allocation3 + $0x4] ss:$8 sps:$4 sm:$0xff]   ;;  %v459_v10 = vlaneseq }
 0x15a   : > { %552 = vmatpush1.bf16.msra.mxu0 %v881_v52  ;;  %v899_v8 = vld [vmem:[#allocation3] ss:$8 sps:$4 sm:$0xff]   ;;  %v457_v13 = vld [vmem:[%s1288_s4] sm:$0x3] }
 0x15b   : > { %553 = vmatprep.subr.bf16.mxu0 %v882_v53  ;;  %v436_v2 = vadd.f32 %v721_v0, %v429_v61  ;;  %v437_v3 = vadd.f32 %v721_v0, %v430_v62  ;;  %v460_v11 = vshrl.u32 %v459_v10, 7 }
 0x15d   : > { %v438_v6 = vmax.f32 %v436_v2, 0.0  ;;  %v439_v7 = vmax.f32 %v437_v3, 0.0  ;;  %v461_v12 = vsub.s32 0, %v460_v11  ;;  %v465_v14 = vsub.s32 1, %v460_v11 }
 0x15e   : > { %554 = vmatpush1.bf16.msra.mxu0 %v884_v54 }
 0x15f   : > { %555 = vmatprep.subr.bf16.mxu0 %v885_v55  ;;  %v440_v9 = vpack.c.bf16 %v439_v7, %v438_v6  ;;  %v462_v15 = vrot.slane %v457_v13, %v461_v12  ;;  %v466_v16 = vrot.slane %v457_v13, %v465_v14 }
 0x162   : > { %556 = vmatpush1.bf16.msra.mxu0 %v887_v56 }
 0x163   : > { %557 = vmatprep.subr.bf16.mxu0 %v888_v57 }
 0x166   : > { %558 = vmatpush1.bf16.msra.mxu0 %v890_v58 }
 0x167   : > { %559 = vmatprep.subr.bf16.mxu0 %v891_v60 }
 0x16a   : > { %560 = vmatpush1.bf16.msra.mxu0 %v893_v63 }
 0x16b   : > { %561 = vmatprep.subr.bf16.mxu0 %v894_v1 }
 0x16e   : > { %562 = vmatpush1.bf16.msra.mxu0 %v896_v4 }
 0x16f   : > { %563 = vmatprep.subr.bf16.mxu0 %v897_v5 }
 0x172   : > { %564 = vmatpush1.bf16.msra.mxu0 %v899_v8 }
 0x175   : > { %582 = vmatmul.mubr.bf16.vlgmr.msra.gmra.mxu0 %v440_v9 }
 0x235   : > { %v583_v17 = vpop.f32.mrf.mxu0 }
 0x236   : > { %v584_v18 = vadd.f32 %v583_v17, %v462_v15 }
 0x237   : > { %v585_v19 = vpop.f32.mrf.mxu0 }
 0x238   : > { %592 = vst [vmem:[%s1194_s10] sm:$0xff] %v584_v18  ;;  %v586_v20 = vadd.f32 %v585_v19, %v466_v16 }
 0x239   : > { %v587_v21 = vpop.f32.mrf.mxu0 }
 0x23a   : > { %593 = vst [vmem:[%s1194_s10 + $0x8] sm:$0xff] %v586_v20  ;;  %v588_v22 = vadd.f32 %v587_v21, %v462_v15 }
 0x23b   : > { %v589_v23 = vpop.f32.mrf.mxu0 }
 0x23c   : > { %594 = vst [vmem:[%s1194_s10 + $0x10] sm:$0xff] %v588_v22  ;;  %v590_v24 = vadd.f32 %v589_v23, %v466_v16 }
 0x23e   : > { %595 = vst [vmem:[%s1194_s10 + $0x18] sm:$0xff] %v590_v24 }
 0x23f PF: > { %s604_s17 = smul.u32 %s1006_s21, %s1010_s22  ;;  %s612_s16 = sshll.u32 %s1194_s10, 4  ;;  %s1224_s16 = int_to_ptr.vmem [resolvable:$true] %s612_s16 }
 0x240   : > { %s1295_s12 = sand.u32 1, %s998_s19   ;;  %s926_s11 = scalar_lea.vmem %s1224_s16, 512 }
 0x241   : > { %s745_s26 = sshll.u32 %s604_s17, 9  ;;  %s1233_s13 = scalar_lea.sflag [#allocation5], %s1295_s12 }
 0x242   : > { %s1229_s6 = scalar_lea.hbm %s1289_s5, %s745_s26  ;;  %p927_p0 = scmp.ne.s32.totalorder %s1224_s16, %s926_s11 }
 0x243   : > { %s1031_s21 = smov [#allocation6]  }
 0x244   : > { %p928_p1 = pnand %p927_p0, %p1118_p6  ;;  %s930_s22 = sshll.u32 %s1031_s21, 4  ;;  %s931_s22 = int_to_ptr.vmem [resolvable:$false] %s930_s22 }
 0x245   : > { %s932_s10 = scalar_lea.vmem %s931_s22, 1024  ;;  %p933_p3 = scmp.lt.s32.totalorder %s1224_s16, %s931_s22 }
 0x246   : > { %p929_p2 = pneg %p928_p1  ;;  %p934_p4 = scmp.lt.s32.totalorder %s932_s10, %s926_s11 }
 0x248   : > { %p935_p5 = por %p934_p4, %p933_p3 }
 0x24a   : > { %p936_p7 = pnand %p935_p5, %p929_p2 }
 0x24c   : > { %939 = shalt.err (!%p936_p7)
}
 0x24d   : > { %s940_s14 = scalar_lea.hbm %s1229_s6, 512  ;;  %s944_s26 = scalar_lea.hbm %s1289_s5, 1024 }
 0x24e   : > { %p941_p9 = scmp.ne.s32.totalorder %s1229_s6, %s940_s14  ;;  %p945_p11 = scmp.lt.s32.totalorder %s1229_s6, %s1289_s5 }
 0x24f   : > { %p946_p12 = scmp.lt.s32.totalorder %s944_s26, %s940_s14 }
 0x250   : > { %p942_p8 = pnand %p941_p9, %p1118_p6 }
 0x251   : > { %p947_p13 = por %p946_p12, %p945_p11 }
 0x252   : > { %p943_p10 = pneg %p942_p8 }
 0x254   : > { %p948_p0 = pnand %p947_p13, %p943_p10 }
 0x256   : > { %951 = shalt.err (!%p948_p0)
}
 0x257   : > { %s1032_s12 = smov 256   ;;  %s1033_s11 = smov 16  }
 0x258   : > { %779 = dma.vmem_to_hbm [thread:$0]  (%p1118_p6), %s1224_s16, 512, %s1229_s6, %s1233_s13, %s1032_s12, %s1032_s12, %s1033_s11  }
 0x259 PF: > { %p791_p1 = scmp.ge.s32.totalorder %s1022_s25, 2  ;;  %s627_s21 = sand.u32 1, %s994_s18  }
 0x25a   : > { %p1296_p2 = scmp.ne.s32.totalorder %s1292_s8, 0  ;;  %s628_s22 = scalar_lea.sflag [#allocation5], %s627_s21 }
 0x25c   : > { %p786_p3 = pnand %p791_p1, %p1296_p2 }
 0x25e   : > { %p787_p4 = pneg %p786_p3 }
 0x260   : > { %989 = dma.done.wait (%p787_p4), %s628_s22, 512  }
 0x261   : > { %991 = vsyncadd (%p787_p4), %s628_s22, 4294966784  ;;  %s19_s25 = sadd.s32 1, %s1022_s25   ;;  %s1297_s18 = smov %s998_s19 }
 0x262   : > { %p16_p5 = scmp.ge.s32.totalorder %s19_s25, 6   ;;  %s1298_s19 = smov %s1002_s20 }
 0x263   : > { %s1299_s20 = smov %s1143_s15  ;;  %s1300_s21 = smov %s1014_s23 }
 0x264   : > { %s1301_s22 = smov %s1018_s24  ;;  %s1302_s23 = smov %s1305_s28 }
 0x265   : > { %s1303_s24 = smov %s1309_s29  ;;  %18 = sbr.rel (!%p16_p5) target bundleno = 6 (0x6), region = 96 }
 0x26a   :  { %633 = vsyncpa [#allocation4], 1 }
 0x26b   :  { %635 = vsyncpa [#allocation4 + $0x1], 1 }
 0x26c   :  { %636 = vsyncpa [#allocation5], 1 }
 0x26d   :  { %638 = vsyncpa [#allocation5 + $0x1], 1 }

</bundles_post_ra>
